<compile_context>
chip_gen: v5e
topology: v5e:2x2
jax: 0.10.0
libtpu: 0.0.40
codegen_flags: <defaults>
</compile_context>

<pallas_src>
import jax
import jax.numpy as jnp
from jax.experimental import pallas as pl
from jax.experimental.pallas import tpu as pltpu

IN_FEATURES = 25
LATENT = 1
OUT_FEATURES = 25

TILE_B_MAX = 4096  # lane-dense batch tile (multiple of 128), safe on v5e/v6e/v7x


def _round_up(x, m):
    return ((x + m - 1) // m) * m


def shallow_net_kernel(b_enc_ref,      # SMEM (1, 1)   scalar encoder bias
                       xT_ref,         # VMEM (25, TILE_B)
                       w_encT_ref,     # VMEM (1, 25)
                       w_dec1T_ref,    # VMEM (25, 1)
                       b_dec1T_ref,    # VMEM (25, 1)
                       w_dec2T_ref,    # VMEM (25, 25)
                       b_dec2T_ref,    # VMEM (25, 1)
                       oT_ref):        # VMEM (25, TILE_B)
    xT = xT_ref[...]  # already float32 (mirrors torch's x.float() in the wrapper)

    # encoder: Linear(25 -> 1) + Tanh   (transposed: (1,25) @ (25,TILE_B))
    hT = jnp.tanh(
        jnp.dot(w_encT_ref[...], xT, preferred_element_type=jnp.float32)
        + b_enc_ref[0, 0]
    )                                                      # (1, TILE_B)

    # decoder[0:2]: Linear(1 -> 25) + Tanh
    # K=1 outer product -> plain VPU broadcast multiply, no MXU round-trip.
    dT = jnp.tanh(w_dec1T_ref[...] * hT + b_dec1T_ref[...])  # (25, TILE_B)

    # decoder[2]: Linear(25 -> 25)   (transposed: (25,25) @ (25,TILE_B))
    oT_ref[...] = (
        jnp.dot(w_dec2T_ref[...], dT, preferred_element_type=jnp.float32)
        + b_dec2T_ref[...]
    )


def shallow_net_forward(x, params):
    """x: (B, 25) any float dtype. params: dict of weights/biases. Returns (B, 25) f32."""
    B = x.shape[0]
    x = x.astype(jnp.float32)

    tile_b = min(TILE_B_MAX, _round_up(B, 128))   # lane-dense tile (>= 128)
    Bp = _round_up(B, tile_b)

    # Wrapper-side layout plumbing (not in-kernel): batch -> lane axis.
    xT = jnp.transpose(x)                          # (25, B)
    if Bp != B:
        xT = jnp.pad(xT, ((0, 0), (0, Bp - B)))    # (25, Bp)

    w_encT = jnp.transpose(params["w_enc"])                    # (1, 25)
    b_enc = params["b_enc"].reshape(1, 1)                      # (1, 1) scalar -> SMEM
    w_dec1T = params["w_dec1"].reshape(-1, 1)                  # (25, 1)
    b_dec1T = params["b_dec1"].reshape(-1, 1)                  # (25, 1)
    w_dec2T = jnp.transpose(params["w_dec2"])                  # (25, 25)
    b_dec2T = params["b_dec2"].reshape(-1, 1)                  # (25, 1)

    grid = (Bp // tile_b,)
    const = lambda i: (0, 0)   # weights/biases: same block every step -> stay VMEM-resident

    outT = pl.pallas_call(
        shallow_net_kernel,
        out_shape=jax.ShapeDtypeStruct((OUT_FEATURES, Bp), jnp.float32),
        grid=grid,
        in_specs=[
            pl.BlockSpec(memory_space=pltpu.MemorySpace.SMEM),              # b_enc
            pl.BlockSpec((IN_FEATURES, tile_b), lambda i: (0, i)),          # xT
            pl.BlockSpec((1, IN_FEATURES), const),                          # w_encT
            pl.BlockSpec((OUT_FEATURES, 1), const),                         # w_dec1T
            pl.BlockSpec((OUT_FEATURES, 1), const),                         # b_dec1T
            pl.BlockSpec((OUT_FEATURES, OUT_FEATURES), const),              # w_dec2T
            pl.BlockSpec((OUT_FEATURES, 1), const),                         # b_dec2T
        ],
        out_specs=pl.BlockSpec((OUT_FEATURES, tile_b), lambda i: (0, i)),
        compiler_params=pltpu.CompilerParams(
            dimension_semantics=("parallel",),
        ),
        cost_estimate=pl.CostEstimate(
            flops=2 * Bp * (IN_FEATURES * LATENT
                            + LATENT * OUT_FEATURES
                            + OUT_FEATURES * OUT_FEATURES),
            transcendentals=Bp * (LATENT + OUT_FEATURES),
            bytes_accessed=4 * Bp * (IN_FEATURES + OUT_FEATURES),
        ),
    )(b_enc, xT, w_encT, w_dec1T, b_dec1T, w_dec2T, b_dec2T)

    # back to PyTorch layout (B, 25), dropping batch padding
    return jnp.transpose(outT[:, :B])


def init_params(key):
    """Deterministic PyTorch-style init: U(-1/sqrt(fan_in), 1/sqrt(fan_in)).
    Weights stored (in_features, out_features) so reference computes x @ W + b."""
    def linear(key, fan_in, fan_out):
        k1, k2 = jax.random.split(key)
        bound = 1.0 / jnp.sqrt(fan_in)
        w = jax.random.uniform(k1, (fan_in, fan_out), jnp.float32, -bound, bound)
        b = jax.random.uniform(k2, (1, fan_out), jnp.float32, -bound, bound)
        return w, b

    k_enc, k_dec1, k_dec2 = jax.random.split(key, 3)
    w_enc, b_enc = linear(k_enc, IN_FEATURES, LATENT)
    w_dec1, b_dec1 = linear(k_dec1, LATENT, OUT_FEATURES)
    w_dec2, b_dec2 = linear(k_dec2, OUT_FEATURES, OUT_FEATURES)
    return dict(w_enc=w_enc, b_enc=b_enc,
                w_dec1=w_dec1, b_dec1=b_dec1,
                w_dec2=w_dec2, b_dec2=b_dec2)


def reference_forward(x, p):
    x = x.astype(jnp.float32)
    h = jnp.tanh(x @ p["w_enc"] + p["b_enc"])
    d = jnp.tanh(h @ p["w_dec1"] + p["b_dec1"])
    return d @ p["w_dec2"] + p["b_dec2"]


if __name__ == "__main__":
    key = jax.random.PRNGKey(0)
    k_params, k_x1, k_x2 = jax.random.split(key, 3)

    params = init_params(k_params)

    # small batch (exercises B < 128 -> single 128-wide padded tile)
    x_small = jax.random.normal(k_x1, (8, IN_FEATURES), jnp.float32)
    out_small = jax.block_until_ready(shallow_net_forward(x_small, params))
    ref_small = reference_forward(x_small, params)
    assert out_small.shape == (8, OUT_FEATURES)
    assert jnp.allclose(out_small, ref_small, atol=1e-4, rtol=1e-4)

    # non-multiple-of-128 batch (exercises the batch-padding path)
    x_odd = jax.random.normal(k_x2, (200, IN_FEATURES), jnp.float32)
    out_odd = jax.block_until_ready(shallow_net_forward(x_odd, params))
    ref_odd = reference_forward(x_odd, params)
    assert out_odd.shape == (200, OUT_FEATURES)
    assert jnp.allclose(out_odd, ref_odd, atol=1e-4, rtol=1e-4)

    print("KERNEL_OK")
</pallas_src>

<mosaic_0001>
module attributes {stable_mosaic.version = 11 : i64} {
  func.func @shallow_net_kernel(%arg0: i32, %arg1: memref<1x1xf32, #tpu.memory_space<smem>>, %arg2: memref<25x128xf32, #tpu.memory_space<vmem>>, %arg3: memref<1x25xf32, #tpu.memory_space<vmem>>, %arg4: memref<25x1xf32, #tpu.memory_space<vmem>>, %arg5: memref<25x1xf32, #tpu.memory_space<vmem>>, %arg6: memref<25x25xf32, #tpu.memory_space<vmem>>, %arg7: memref<25x1xf32, #tpu.memory_space<vmem>>, %arg8: memref<25x128xf32, #tpu.memory_space<vmem>>) attributes {dimension_semantics = [#tpu.dimension_semantics<parallel>], iteration_bounds = array<i64: 1>, scalar_prefetch = 0 : i64, scratch_operands = 0 : i64, tpu.core_type = #tpu.core_type<tc>, window_params = [{transform_indices = @transform_0, window_bounds = array<i64: 1, 1>}, {transform_indices = @transform_1, window_bounds = array<i64: 25, 128>}, {pipeline_mode = #tpu.pipeline_mode<synchronous>, transform_indices = @transform_2, window_bounds = array<i64: 1, 25>}, {pipeline_mode = #tpu.pipeline_mode<synchronous>, transform_indices = @transform_3, window_bounds = array<i64: 25, 1>}, {pipeline_mode = #tpu.pipeline_mode<synchronous>, transform_indices = @transform_4, window_bounds = array<i64: 25, 1>}, {pipeline_mode = #tpu.pipeline_mode<synchronous>, transform_indices = @transform_5, window_bounds = array<i64: 25, 25>}, {pipeline_mode = #tpu.pipeline_mode<synchronous>, transform_indices = @transform_6, window_bounds = array<i64: 25, 1>}, {transform_indices = @transform_7, window_bounds = array<i64: 25, 128>}]} {
    %c0 = arith.constant 0 : index
    %c0_0 = arith.constant 0 : index
    %0 = vector.load %arg2[%c0, %c0_0] : memref<25x128xf32, #tpu.memory_space<vmem>>, vector<25x128xf32>
    %c0_1 = arith.constant 0 : index
    %c0_2 = arith.constant 0 : index
    %1 = vector.load %arg3[%c0_1, %c0_2] : memref<1x25xf32, #tpu.memory_space<vmem>>, vector<1x25xf32>
    %cst = arith.constant dense<0.000000e+00> : vector<1x128xf32>
    %2 = tpu.matmul %1, %0, %cst {dimension_numbers = #tpu.dot_dimension_numbers<[1], [0], [0], [1], [0, 0, 1, 1], [], []>} : vector<1x25xf32>, vector<25x128xf32>, vector<1x128xf32> -> vector<1x128xf32>
    %c0_3 = arith.constant 0 : index
    %c0_4 = arith.constant 0 : index
    %3 = memref.load %arg1[%c0_3, %c0_4] : memref<1x1xf32, #tpu.memory_space<smem>>
    %4 = vector.broadcast %3 : f32 to vector<1x128xf32>
    %5 = arith.addf %2, %4 : vector<1x128xf32>
    %6 = math.tanh %5 : vector<1x128xf32>
    %c0_5 = arith.constant 0 : index
    %c0_6 = arith.constant 0 : index
    %7 = vector.load %arg4[%c0_5, %c0_6] : memref<25x1xf32, #tpu.memory_space<vmem>>, vector<25x1xf32>
    %8 = vector.broadcast %7 : vector<25x1xf32> to vector<25x128xf32>
    %9 = vector.broadcast %6 : vector<1x128xf32> to vector<25x128xf32>
    %10 = arith.mulf %8, %9 : vector<25x128xf32>
    %c0_7 = arith.constant 0 : index
    %c0_8 = arith.constant 0 : index
    %11 = vector.load %arg5[%c0_7, %c0_8] : memref<25x1xf32, #tpu.memory_space<vmem>>, vector<25x1xf32>
    %12 = vector.broadcast %11 : vector<25x1xf32> to vector<25x128xf32>
    %13 = arith.addf %10, %12 : vector<25x128xf32>
    %14 = math.tanh %13 : vector<25x128xf32>
    %c0_9 = arith.constant 0 : index
    %c0_10 = arith.constant 0 : index
    %15 = vector.load %arg6[%c0_9, %c0_10] : memref<25x25xf32, #tpu.memory_space<vmem>>, vector<25x25xf32>
    %cst_11 = arith.constant dense<0.000000e+00> : vector<25x128xf32>
    %16 = tpu.matmul %15, %14, %cst_11 {dimension_numbers = #tpu.dot_dimension_numbers<[1], [0], [0], [1], [0, 0, 1, 1], [], []>} : vector<25x25xf32>, vector<25x128xf32>, vector<25x128xf32> -> vector<25x128xf32>
    %c0_12 = arith.constant 0 : index
    %c0_13 = arith.constant 0 : index
    %17 = vector.load %arg7[%c0_12, %c0_13] : memref<25x1xf32, #tpu.memory_space<vmem>>, vector<25x1xf32>
    %18 = vector.broadcast %17 : vector<25x1xf32> to vector<25x128xf32>
    %19 = arith.addf %16, %18 : vector<25x128xf32>
    %c0_14 = arith.constant 0 : index
    %c0_15 = arith.constant 0 : index
    %20 = vector.load %arg8[%c0_14, %c0_15] : memref<25x128xf32, #tpu.memory_space<vmem>>, vector<25x128xf32>
    tpu.vector_store %arg8[%c0_14, %c0_15], %19 {strides = array<i32>} : memref<25x128xf32, #tpu.memory_space<vmem>>, vector<25x128xf32>,
    return
  }
  func.func @transform_0(%arg0: i32) -> (i32, i32) {
    %c0_i32 = arith.constant 0 : i32
    %c0_i32_0 = arith.constant 0 : i32
    %c0_i32_1 = arith.constant 0 : i32
    return %c0_i32, %c0_i32_0 : i32, i32
  }
  func.func @transform_1(%arg0: i32) -> (i32, i32) {
    %c0_i32 = arith.constant 0 : i32
    %c0_i32_0 = arith.constant 0 : i32
    return %c0_i32, %arg0 : i32, i32
  }
  func.func @transform_2(%arg0: i32) -> (i32, i32) {
    %c0_i32 = arith.constant 0 : i32
    %c0_i32_0 = arith.constant 0 : i32
    %c0_i32_1 = arith.constant 0 : i32
    return %c0_i32, %c0_i32_0 : i32, i32
  }
  func.func @transform_3(%arg0: i32) -> (i32, i32) {
    %c0_i32 = arith.constant 0 : i32
    %c0_i32_0 = arith.constant 0 : i32
    %c0_i32_1 = arith.constant 0 : i32
    return %c0_i32, %c0_i32_0 : i32, i32
  }
  func.func @transform_4(%arg0: i32) -> (i32, i32) {
    %c0_i32 = arith.constant 0 : i32
    %c0_i32_0 = arith.constant 0 : i32
    %c0_i32_1 = arith.constant 0 : i32
    return %c0_i32, %c0_i32_0 : i32, i32
  }
  func.func @transform_5(%arg0: i32) -> (i32, i32) {
    %c0_i32 = arith.constant 0 : i32
    %c0_i32_0 = arith.constant 0 : i32
    %c0_i32_1 = arith.constant 0 : i32
    return %c0_i32, %c0_i32_0 : i32, i32
  }
  func.func @transform_6(%arg0: i32) -> (i32, i32) {
    %c0_i32 = arith.constant 0 : i32
    %c0_i32_0 = arith.constant 0 : i32
    %c0_i32_1 = arith.constant 0 : i32
    return %c0_i32, %c0_i32_0 : i32, i32
  }
  func.func @transform_7(%arg0: i32) -> (i32, i32) {
    %c0_i32 = arith.constant 0 : i32
    %c0_i32_0 = arith.constant 0 : i32
    return %c0_i32, %arg0 : i32, i32
  }
}

</mosaic_0001>

<bundles_post_ra>
// kernel: tpu_custom_call.1
= control target key start
LH: loop header
LB: loop body
LE: loop exit
PB: predicated region body
PF: predicated region fallthrough
CT: control target
= control target key end

     0   :  { %vm39_vm0 = vcmask 1040384   ;;  %v277_v2 = vmov 0   ;;  %vm35_vm1 = vcmask 203776   ;;  %s399_s0 = inlined_call_operand.<no memory space> [shape: f32[1,1], index: 0, kind: input, shape index: {}]   ;;  %s400_s1 = inlined_call_operand.vmem [shape: f32[25,128], index: 1, kind: input, shape index: {}]   ;;  %s401_s2 = inlined_call_operand.vmem [shape: f32[1,25], index: 2, kind: input, shape index: {}]   ;;  %s402_s3 = inlined_call_operand.vmem [shape: f32[25,1], index: 3, kind: input, shape index: {}]   ;;  %s403_s4 = inlined_call_operand.vmem [shape: f32[25,1], index: 4, kind: input, shape index: {}]   ;;  %s404_s5 = inlined_call_operand.vmem [shape: f32[25,25], index: 5, kind: input, shape index: {}]   ;;  %s405_s6 = inlined_call_operand.vmem [shape: f32[25,1], index: 6, kind: input, shape index: {}]   ;;  %s406_s7 = inlined_call_operand.hbm [shape: f32[25,128], index: 7, kind: output, shape index: {}]  }
   0x1   :  { %v31_v0 = vld [vmem:[%s400_s1 + $0x18] sm:$0x1]  ;;  %239 = vset.pattern.permute.xlu1 %v277_v2  ;;  %238 = vset.pattern.permute.xlu0 %v277_v2  ;;  %v30_v4 = vld [vmem:[%s400_s1 + $0x10] sm:$0xff]  ;;  %v29_v5 = vld [vmem:[%s400_s1 + $0x8] sm:$0xff] }
   0x2   :  { %v96_v1 = vld [vmem:[%s403_s4 + $0x18] sm:$0x1]  ;;  %219 = vmatpush.msk.msra.mxu0 %vm39_vm0, %v31_v0  ;;  %240 = vset.pattern.permute.xlu2 %v277_v2  ;;  %v95_v6 = vld [vmem:[%s403_s4 + $0x10] sm:$0xff]  ;;  %v28_v7 = vld [vmem:[%s400_s1] sm:$0xff] }
   0x3   :  { %v67_v3 = vld [vmem:[%s402_s3 + $0x18] sm:$0x1]  ;;  %114 = vperm.xlu1 %239, %v96_v1   ;;  %109 = vperm.xlu2 %240, %v95_v6   ;;  %v32_v8 = vld [vmem:[%s401_s2] sm:$0x1] }
   0x4   :  { %85 = vperm.xlu0 %238, %v67_v3   ;;  %56 = vmatpush.msra.mxu0 %v30_v4 }
   0x6   :  { %57 = vmatpush.msra.mxu0 %v29_v5 }
   0x7   :  { %13 = vsyncpa [#allocation4], 0  ;;  %v65_v9 = vld [vmem:[%s402_s3 + $0x8] sm:$0xff]  ;;  %v66_v10 = vld [vmem:[%s402_s3 + $0x10] sm:$0xff]  ;;  %v34_v19 = vstv %s399_s0  ;;  %s278_s16 = smov [#allocation3]   ;;  %s279_s20 = smov 128  }
   0x8   :  { %58 = vmatpush.msra.mxu0 %v28_v7  ;;  %v64_v11 = vld [vmem:[%s402_s3] sm:$0xff]  ;;  %v94_v13 = vld [vmem:[%s403_s4 + $0x8] sm:$0xff]  ;;  %v131_v15 = vld [vmem:[%s405_s6 + $0x10] sm:$0xff]  ;;  %s205_s17 = sshll.u32 %s278_s16, 4  ;;  %s280_s1 = smov 8   ;;  %s206_s17 = int_to_ptr.vmem [resolvable:$true] %s205_s17 }
   0x9   :  { %220 = vmatmul.msk.f32.vlgmr.msra.gmra.mxu0 %vm35_vm1, %v32_v8  ;;  %v93_v12 = vld [vmem:[%s403_s4] sm:$0xff]  ;;  %v130_v16 = vld [vmem:[%s405_s6 + $0x8] sm:$0xff]  ;;  %v132_v17 = vld [vmem:[%s405_s6 + $0x18] sm:$0x1] }
   0xa   :  { %v129_v14 = vld [vmem:[%s405_s6] sm:$0xff]  ;;  %v126_v44 = vld [vmem:[%s404_s5 + $0x8] sm:$0xff]  ;;  %v127_v45 = vld [vmem:[%s404_s5 + $0x10] sm:$0xff] }
   0xb   :  { %75 = vperm.xlu1 %239, %v65_v9   ;;  %70 = vperm.xlu2 %240, %v64_v11   ;;  %v125_v42 = vld [vmem:[%s404_s5] sm:$0xff]  ;;  %v128_v46 = vld [vmem:[%s404_s5 + $0x18] sm:$0x1]  ;;  %s207_s5 = sshll.u32 %s406_s7, 4  ;;  %s208_s5 = int_to_ptr.hbm [resolvable:$true] %s207_s5 }
   0xc   :  { %80 = vperm.xlu0 %238, %v66_v10  }
  0x13   :  { %99 = vperm.xlu1 %239, %v93_v12   ;;  %135 = vperm.xlu2 %240, %v129_v14  }
  0x14   :  { %104 = vperm.xlu0 %238, %v94_v13  }
  0x1b   :  { %145 = vperm.xlu1 %239, %v131_v15   ;;  %150 = vperm.xlu2 %240, %v132_v17  }
  0x1c   :  { %140 = vperm.xlu0 %238, %v130_v16  }
  0x5d   :  { %v110_v23 = vpop.permute.xlu2 %109 }
  0x65   :  { %v71_v32 = vpop.permute.xlu2 %70 }
  0x6d   :  { %v136_v47 = vpop.permute.xlu2 %135 }
  0x75   :  { %v115_v20 = vpop.permute.xlu1 %114  ;;  %v151_v56 = vpop.permute.xlu2 %150 }
  0x76   :  { %v86_v18 = vpop.permute.xlu0 %85 }
  0x7d   :  { %v76_v26 = vpop.permute.xlu1 %75 }
  0x7e   :  { %v81_v24 = vpop.permute.xlu0 %80 }
  0x85   :  { %v100_v37 = vpop.permute.xlu1 %99 }
  0x86   :  { %v60_v21 = vpop.f32.mrf.mxu0  ;;  %v105_v35 = vpop.permute.xlu0 %104 }
  0x87   :  { %v61_v22 = vadd.f32 %v60_v21, %v34_v19 }
  0x89   :  { %241 = vtanh.f32 %v61_v22 }
  0x8d   :  { %v146_v51 = vpop.permute.xlu1 %145 }
  0x8e   :  { %v141_v50 = vpop.permute.xlu0 %140 }
  0x8f   :  { %v242_v25 = vpop.eup %241 }
  0x90   :  { %v88_v27 = vperm.slane %v242_v25, 0 }
  0x92   :  { %v92_v28 = vmul.f32 %v88_v27, %v86_v18  ;;  %v91_v29 = vmul.f32 %v88_v27, %v81_v24  ;;  %v90_v30 = vmul.f32 %v88_v27, %v76_v26  ;;  %v89_v33 = vmul.f32 %v88_v27, %v71_v32 }
  0x94   :  { %v120_v31 = vadd.f32 %v115_v20, %v92_v28  ;;  %v119_v34 = vadd.f32 %v110_v23, %v91_v29  ;;  %v118_v36 = vadd.f32 %v105_v35, %v90_v30  ;;  %v117_v38 = vadd.f32 %v100_v37, %v89_v33 }
  0x96   :  { %243 = vtanh.f32 %v120_v31 }
  0x97   :  { %245 = vtanh.f32 %v119_v34 }
  0x98   :  { %247 = vtanh.f32 %v118_v36 }
  0x99   :  { %249 = vtanh.f32 %v117_v38 }
  0x9c   :  { %v244_v39 = vpop.eup %243 }
  0x9d   :  { %221 = vmatpush.msk.msra.mxu1 %vm39_vm0, %v244_v39  ;;  %226 = vmatpush.msk.msra.mxu2 %vm39_vm0, %v244_v39  ;;  %v246_v40 = vpop.eup %245 }
  0x9e   :  { %227 = vmatpush.msk.msra.mxu3 %vm39_vm0, %v244_v39  ;;  %v248_v41 = vpop.eup %247 }
  0x9f   :  { %181 = vmatpush.msra.mxu1 %v246_v40  ;;  %228 = vmatpush.msra.mxu2 %v246_v40  ;;  %v250_v43 = vpop.eup %249 }
  0xa0   :  { %229 = vmatpush.msra.mxu3 %v246_v40 }
  0xa1   :  { %182 = vmatpush.msra.mxu1 %v248_v41  ;;  %230 = vmatpush.msra.mxu2 %v248_v41 }
  0xa2   :  { %231 = vmatpush.msra.mxu3 %v248_v41 }
  0xa3   :  { %183 = vmatpush.msra.mxu1 %v250_v43  ;;  %232 = vmatpush.msra.mxu2 %v250_v43 }
  0xa4   :  { %233 = vmatpush.msra.mxu3 %v250_v43  ;;  %222 = vmatmul.msk.f32.vlgmr.msra.gmra.mxu1 %vm35_vm1, %v125_v42 }
  0xa5   :  { %223 = vmatmul.msk.f32.vlgmr.msra.gmra.mxu2 %vm35_vm1, %v126_v44  ;;  %224 = vmatmul.msk.f32.vlgmr.msra.gmra.mxu3 %vm35_vm1, %v127_v45 }
  0xad   :  { %225 = vmatmul.msk.f32.gmra.mxu3 %vm35_vm1, %v128_v46 }
 0x121   :  { %v185_v48 = vpop.f32.mrf.mxu1 }
 0x122   :  { %v186_v49 = vadd.f32 %v185_v48, %v136_v47 }
 0x124   :  { %197 = vst [vmem:[#allocation3] sm:$0xff] %v186_v49 }
 0x128   :  { %v188_v52 = vpop.f32.mrf.mxu2  ;;  %v191_v53 = vpop.f32.mrf.mxu3 }
 0x129   :  { %v189_v54 = vadd.f32 %v188_v52, %v141_v50  ;;  %v192_v55 = vadd.f32 %v191_v53, %v146_v51 }
 0x12b   :  { %198 = vst [vmem:[#allocation3 + $0x8] sm:$0xff] %v189_v54 }
 0x12c   :  { %199 = vst [vmem:[#allocation3 + $0x10] sm:$0xff] %v192_v55 }
 0x130   :  { %v194_v57 = vpop.f32.mrf.mxu3 }
 0x131   :  { %v195_v58 = vadd.f32 %v194_v57, %v151_v56 }
 0x133   :  { %200 = vst [vmem:[#allocation3 + $0x18] sm:$0x1] %v195_v58 }
 0x134   :  { %213 = dma.vmem_to_hbm [thread:$0]  %s206_s17, 512, %s208_s5, [#allocation4], %s279_s20, %s279_s20, %s280_s1  }
 0x135   :  { %275 = dma.done.wait [#allocation4], 512  }
 0x136   :  { %276 = vsyncadd [#allocation4], 4294966784 }
 0x137   :  { %218 = vsyncpa [#allocation4], 1 }

</bundles_post_ra>
